<compile_context>
chip_gen: v5e
topology: v5e:2x2
jax: 0.10.0
libtpu: 0.0.40
codegen_flags: <defaults>
</compile_context>

<pallas_src>
import functools

import jax
import jax.numpy as jnp
from jax.experimental import pallas as pl
from jax.experimental.pallas import tpu as pltpu


def _round_up(x: int, m: int) -> int:
    return (x + m - 1) // m * m


def _cdiv(a: int, b: int) -> int:
    return (a + b - 1) // b


def _pick_tile(dim: int, align: int, cap: int) -> int:
    """Tile size (multiple of `align`, <= cap) minimizing ceil(dim/t)*t."""
    aligned = _round_up(dim, align)
    if aligned <= cap:
        return aligned
    n_blocks = _cdiv(dim, cap)
    return min(cap, _round_up(_cdiv(dim, n_blocks), align))


def _footprint_bytes(tm: int, tn: int, tk: int, itemsize: int = 4) -> int:
    # Double-buffered x / W / bias / out tiles + resident f32 accumulator.
    return (2 * (tm * tk + tk * tn + tn + tm * tn) + tm * tn) * itemsize


def _langevin_kernel(x_ref, w_ref, b_ref, o_ref, acc_ref, *, k_total, tk, mask_k):
    """One (tm, tn) output tile, accumulated over the K grid axis."""
    k = pl.program_id(2)

    @pl.when(k == 0)
    def _():
        # Fold the bias into the accumulator init (broadcast (1, tn) -> (tm, tn)).
        acc_ref[...] = jnp.broadcast_to(b_ref[...], acc_ref.shape).astype(jnp.float32)

    x = x_ref[...]
    w = w_ref[...]
    if mask_k:
        # K is not a multiple of tk: zero the out-of-range K slab on both
        # operands (garbage beyond K would otherwise contaminate valid outputs).
        kcol = k * tk + jax.lax.broadcasted_iota(jnp.int32, x.shape, 1)
        x = jnp.where(kcol < k_total, x, 0.0)
        krow = k * tk + jax.lax.broadcasted_iota(jnp.int32, w.shape, 0)
        w = jnp.where(krow < k_total, w, 0.0)

    # MXU matmul with f32 accumulation.
    acc_ref[...] += jnp.dot(x, w, preferred_element_type=jnp.float32)

    @pl.when(k == pl.num_programs(2) - 1)
    def _():
        o_ref[...] = acc_ref[...].astype(o_ref.dtype)


def langevin_layer(x, weights, biases, *, tm_max=512, tn_max=512, tk_max=2048):
    """y = x @ weights + biases, computed in a Pallas TPU kernel.

    x:       (M, K) float32
    weights: (K, N) float32
    biases:  (N,)   float32
    """
    M, K = x.shape
    K2, N = weights.shape
    assert K == K2, "input_dim mismatch"
    assert biases.shape == (N,)

    # ---- generation-aware VMEM budget ----
    try:
        vmem_cap = int(pltpu.get_tpu_info().vmem_capacity_bytes)
    except Exception:
        vmem_cap = 64 * 1024 * 1024  # conservative (v7x physical VMEM)
    vmem_limit = max(32 * 1024 * 1024,
                     min(int(vmem_cap * 0.7), 96 * 1024 * 1024))

    # ---- tile selection: minimize padded work, stay lane/sublane aligned ----
    tm = _pick_tile(M, 8, tm_max)      # sublane-aligned rows, no 128 constraint
    tn = _pick_tile(N, 128, tn_max)    # lane-dense output columns
    tk = _pick_tile(K, 128, tk_max)    # lane-aligned reduction slab

    # Shrink tiles if the double-buffered footprint would not fit the budget.
    budget = int(vmem_limit * 0.8)
    while _footprint_bytes(tm, tn, tk) > budget and tk > 128:
        tk = max(128, _round_up(tk // 2, 128))
    while _footprint_bytes(tm, tn, tk) > budget and tn > 128:
        tn = max(128, _round_up(tn // 2, 128))
    while _footprint_bytes(tm, tn, tk) > budget and tm > 8:
        tm = max(8, _round_up(tm // 2, 8))

    grid = (_cdiv(M, tm), _cdiv(N, tn), _cdiv(K, tk))
    gm, gn, gk = grid
    mask_k = (K % tk) != 0

    b2d = biases.reshape(1, N)

    # Advisory cost: include operand re-reads across the M/N grid.
    cost = pl.CostEstimate(
        flops=2 * (gm * tm) * (gk * tk) * (gn * tn),
        transcendentals=0,
        bytes_accessed=4 * (M * K * gn + K * N * gm + M * N + N),
    )

    kernel = functools.partial(_langevin_kernel, k_total=K, tk=tk, mask_k=mask_k)

    return pl.pallas_call(
        kernel,
        out_shape=jax.ShapeDtypeStruct((M, N), x.dtype),
        grid_spec=pltpu.PrefetchScalarGridSpec(
            num_scalar_prefetch=0,
            grid=grid,
            in_specs=[
                pl.BlockSpec((tm, tk), lambda i, j, k: (i, k)),   # x tile
                pl.BlockSpec((tk, tn), lambda i, j, k: (k, j)),   # W tile
                pl.BlockSpec((1, tn), lambda i, j, k: (0, j)),    # bias row tile
            ],
            out_specs=pl.BlockSpec((tm, tn), lambda i, j, k: (i, j)),
            scratch_shapes=[pltpu.VMEM((tm, tn), jnp.float32)],
        ),
        compiler_params=pltpu.CompilerParams(
            dimension_semantics=("parallel", "parallel", "arbitrary"),
            vmem_limit_bytes=vmem_limit,
        ),
        cost_estimate=cost,
    )(x, weights, b2d)


if __name__ == "__main__":
    key = jax.random.PRNGKey(0)

    # --- Small shapes consistent with the module: batch=8, in=32, out=32. ---
    batch, input_dim, output_dim = 8, 32, 32
    kx, kw, kb = jax.random.split(key, 3)
    x = jax.random.normal(kx, (batch, input_dim), dtype=jnp.float32)
    weights = jax.random.uniform(
        kw, (input_dim, output_dim), minval=-0.01, maxval=0.01, dtype=jnp.float32
    )
    biases = jax.random.uniform(
        kb, (output_dim,), minval=-0.01, maxval=0.01, dtype=jnp.float32
    )

    y = langevin_layer(x, weights, biases)
    jax.block_until_ready(y)
    y_ref = x @ weights + biases
    assert y.shape == (batch, output_dim)
    assert jnp.allclose(y, y_ref, atol=1e-5, rtol=1e-5)

    # --- Non-aligned shape: partial M/N blocks + in-kernel K mask, grid 1x1x1. ---
    M2, K2, N2 = 300, 272, 200
    kx2, kw2, kb2 = jax.random.split(jax.random.PRNGKey(1), 3)
    x2 = jax.random.normal(kx2, (M2, K2), dtype=jnp.float32)
    w2 = jax.random.uniform(kw2, (K2, N2), minval=-0.01, maxval=0.01,
                            dtype=jnp.float32)
    b2 = jax.random.uniform(kb2, (N2,), minval=-0.01, maxval=0.01,
                            dtype=jnp.float32)
    y2 = langevin_layer(x2, w2, b2)
    jax.block_until_ready(y2)
    y2_ref = x2 @ w2 + b2
    assert y2.shape == (M2, N2)
    assert jnp.allclose(y2, y2_ref, atol=1e-4, rtol=1e-4)

    # --- Multi-block grid on all three axes (3x2x3) with partial edges. ---
    M3, K3, N3 = 520, 700, 300
    kx3, kw3, kb3 = jax.random.split(jax.random.PRNGKey(2), 3)
    x3 = jax.random.normal(kx3, (M3, K3), dtype=jnp.float32)
    w3 = jax.random.uniform(kw3, (K3, N3), minval=-0.01, maxval=0.01,
                            dtype=jnp.float32)
    b3 = jax.random.uniform(kb3, (N3,), minval=-0.01, maxval=0.01,
                            dtype=jnp.float32)
    y3 = langevin_layer(x3, w3, b3, tm_max=256, tn_max=256, tk_max=256)
    jax.block_until_ready(y3)
    y3_ref = x3 @ w3 + b3
    assert y3.shape == (M3, N3)
    assert jnp.allclose(y3, y3_ref, atol=1e-3, rtol=1e-3)

    print("KERNEL_OK")
</pallas_src>

<mosaic_0001>
module attributes {stable_mosaic.version = 11 : i64} {
  func.func @_langevin_kernel(%arg0: i32, %arg1: i32, %arg2: i32, %arg3: memref<8x128xf32, #tpu.memory_space<vmem>>, %arg4: memref<128x128xf32, #tpu.memory_space<vmem>>, %arg5: memref<1x128xf32, #tpu.memory_space<vmem>>, %arg6: memref<8x128xf32, #tpu.memory_space<vmem>>, %arg7: memref<8x128xf32, #tpu.memory_space<vmem>>) attributes {dimension_semantics = [#tpu.dimension_semantics<parallel>, #tpu.dimension_semantics<parallel>, #tpu.dimension_semantics<arbitrary>], iteration_bounds = array<i64: 1, 1, 1>, scalar_prefetch = 0 : i64, scratch_operands = 1 : i64, tpu.core_type = #tpu.core_type<tc>, window_params = [{transform_indices = @transform_0, window_bounds = array<i64: 8, 128>}, {transform_indices = @transform_1, window_bounds = array<i64: 128, 128>}, {transform_indices = @transform_2, window_bounds = array<i64: 1, 128>}, {transform_indices = @transform_3, window_bounds = array<i64: 8, 128>}]} {
    %c0_i32 = arith.constant 0 : i32
    %0 = arith.cmpi eq, %arg2, %c0_i32 : i32
    %1 = arith.extui %0 : i1 to i32
    %c0_i32_0 = arith.constant 0 : i32
    %2 = arith.cmpi ne, %1, %c0_i32_0 : i32
    scf.if %2 {
      %c0_14 = arith.constant 0 : index
      %c0_15 = arith.constant 0 : index
      %28 = vector.load %arg5[%c0_14, %c0_15] : memref<1x128xf32, #tpu.memory_space<vmem>>, vector<1x128xf32>
      %29 = vector.shape_cast %28 : vector<1x128xf32> to vector<1x128xf32>
      %30 = vector.broadcast %29 : vector<1x128xf32> to vector<8x128xf32>
      %c0_16 = arith.constant 0 : index
      %c0_17 = arith.constant 0 : index
      %31 = vector.load %arg7[%c0_16, %c0_17] : memref<8x128xf32, #tpu.memory_space<vmem>>, vector<8x128xf32>
      tpu.vector_store %arg7[%c0_16, %c0_17], %30 {strides = array<i32>} : memref<8x128xf32, #tpu.memory_space<vmem>>, vector<8x128xf32>,
    } else {
    }
    %c0 = arith.constant 0 : index
    %c0_1 = arith.constant 0 : index
    %3 = vector.load %arg3[%c0, %c0_1] : memref<8x128xf32, #tpu.memory_space<vmem>>, vector<8x128xf32>
    %c0_2 = arith.constant 0 : index
    %c0_3 = arith.constant 0 : index
    %4 = vector.load %arg4[%c0_2, %c0_3] : memref<128x128xf32, #tpu.memory_space<vmem>>, vector<128x128xf32>
    %c128_i32 = arith.constant 128 : i32
    %5 = arith.muli %arg2, %c128_i32 : i32
    %6 = tpu.iota {dimensions = array<i32: 1>} : vector<8x128xi32>
    %7 = vector.broadcast %5 : i32 to vector<8x128xi32>
    %8 = arith.addi %7, %6 : vector<8x128xi32>
    %c32_i32 = arith.constant 32 : i32
    %9 = vector.broadcast %c32_i32 : i32 to vector<8x128xi32>
    %10 = arith.cmpi slt, %8, %9 : vector<8x128xi32>
    %cst = arith.constant 0.000000e+00 : f32
    %11 = vector.broadcast %cst : f32 to vector<8x128xf32>
    %12 = arith.select %10, %3, %11 : vector<8x128xi1>, vector<8x128xf32>
    %c128_i32_4 = arith.constant 128 : i32
    %13 = arith.muli %arg2, %c128_i32_4 : i32
    %14 = tpu.iota {dimensions = array<i32: 0>} : vector<128x128xi32>
    %15 = vector.broadcast %13 : i32 to vector<128x128xi32>
    %16 = arith.addi %15, %14 : vector<128x128xi32>
    %c32_i32_5 = arith.constant 32 : i32
    %17 = vector.broadcast %c32_i32_5 : i32 to vector<128x128xi32>
    %18 = arith.cmpi slt, %16, %17 : vector<128x128xi32>
    %cst_6 = arith.constant 0.000000e+00 : f32
    %19 = vector.broadcast %cst_6 : f32 to vector<128x128xf32>
    %20 = arith.select %18, %4, %19 : vector<128x128xi1>, vector<128x128xf32>
    %c0_7 = arith.constant 0 : index
    %c0_8 = arith.constant 0 : index
    %21 = vector.load %arg7[%c0_7, %c0_8] : memref<8x128xf32, #tpu.memory_space<vmem>>, vector<8x128xf32>
    %cst_9 = arith.constant dense<0.000000e+00> : vector<8x128xf32>
    %22 = tpu.matmul %12, %20, %cst_9 {dimension_numbers = #tpu.dot_dimension_numbers<[1], [0], [0], [1], [0, 0, 1, 1], [], []>} : vector<8x128xf32>, vector<128x128xf32>, vector<8x128xf32> -> vector<8x128xf32>
    %23 = arith.addf %21, %22 : vector<8x128xf32>
    %c0_10 = arith.constant 0 : index
    %c0_11 = arith.constant 0 : index
    %24 = vector.load %arg7[%c0_10, %c0_11] : memref<8x128xf32, #tpu.memory_space<vmem>>, vector<8x128xf32>
    tpu.vector_store %arg7[%c0_10, %c0_11], %23 {strides = array<i32>} : memref<8x128xf32, #tpu.memory_space<vmem>>, vector<8x128xf32>,
    %c0_i32_12 = arith.constant 0 : i32
    %25 = arith.cmpi eq, %arg2, %c0_i32_12 : i32
    %26 = arith.extui %25 : i1 to i32
    %c0_i32_13 = arith.constant 0 : i32
    %27 = arith.cmpi ne, %26, %c0_i32_13 : i32
    scf.if %27 {
      %c0_14 = arith.constant 0 : index
      %c0_15 = arith.constant 0 : index
      %28 = vector.load %arg7[%c0_14, %c0_15] : memref<8x128xf32, #tpu.memory_space<vmem>>, vector<8x128xf32>
      %c0_16 = arith.constant 0 : index
      %c0_17 = arith.constant 0 : index
      %29 = vector.load %arg6[%c0_16, %c0_17] : memref<8x128xf32, #tpu.memory_space<vmem>>, vector<8x128xf32>
      tpu.vector_store %arg6[%c0_16, %c0_17], %28 {strides = array<i32>} : memref<8x128xf32, #tpu.memory_space<vmem>>, vector<8x128xf32>,
    } else {
    }
    return
  }
  func.func @transform_0(%arg0: i32, %arg1: i32, %arg2: i32) -> (i32, i32) {
    %c0_i32 = arith.constant 0 : i32
    return %arg0, %arg2 : i32, i32
  }
  func.func @transform_1(%arg0: i32, %arg1: i32, %arg2: i32) -> (i32, i32) {
    %c0_i32 = arith.constant 0 : i32
    return %arg2, %arg1 : i32, i32
  }
  func.func @transform_2(%arg0: i32, %arg1: i32, %arg2: i32) -> (i32, i32) {
    %c0_i32 = arith.constant 0 : i32
    %c0_i32_0 = arith.constant 0 : i32
    return %c0_i32, %arg1 : i32, i32
  }
  func.func @transform_3(%arg0: i32, %arg1: i32, %arg2: i32) -> (i32, i32) {
    %c0_i32 = arith.constant 0 : i32
    return %arg0, %arg1 : i32, i32
  }
}

</mosaic_0001>

<bundles_post_ra>
// kernel: tpu_custom_call.1
= control target key start
LH: loop header
LB: loop body
LE: loop exit
PB: predicated region body
PF: predicated region fallthrough
CT: control target
= control target key end

     0   :  { %8 = vsyncpa [#allocation4], 0  ;;  %s311_s0 = inlined_call_operand.hbm [shape: f32[8,32], index: 0, kind: input, shape index: {}]   ;;  %s312_s1 = inlined_call_operand.hbm [shape: f32[32,32], index: 1, kind: input, shape index: {}]   ;;  %s313_s2 = inlined_call_operand.vmem [shape: f32[1,32], index: 2, kind: input, shape index: {}]   ;;  %s314_s3 = inlined_call_operand.hbm [shape: f32[8,32], index: 3, kind: output, shape index: {}]  }
   0x1   :  { %9 = vsyncpa [#allocation7], 0 }
   0x2   :  { %10 = vsyncpa [#allocation5], 0  ;;  %s16_s14 = sshll.u32 %s311_s0, 4  ;;  %s274_s15 = smov [#allocation3]   ;;  %s17_s14 = int_to_ptr.hbm [resolvable:$true] %s16_s14 }
   0x3   :  { %s18_s16 = sshll.u32 %s274_s15, 4  ;;  %s19_s16 = int_to_ptr.vmem [resolvable:$true] %s18_s16 }
   0x4   :  { %21 = dma.hbm_to_vmem [thread:$0]  %s17_s14, 128, %s19_s16, [#allocation4]  }
   0x5   :  { %25 = vsyncadd [#allocation7], 1536  ;;  %s26_s19 = sshll.u32 %s312_s1, 4  ;;  %s275_s20 = smov [#allocation6]   ;;  %s27_s19 = int_to_ptr.hbm [resolvable:$true] %s26_s19 }
   0x6   :  { %s28_s21 = sshll.u32 %s275_s20, 4  ;;  %s276_s22 = smov 128   ;;  %s29_s21 = int_to_ptr.vmem [resolvable:$true] %s28_s21 }
   0x7   :  { %s277_s23 = smov 8  }
   0x8   :  { %34 = dma.hbm_to_vmem [thread:$0]  %s27_s19, 512, %s29_s21, [#allocation7], %s276_s22, %s276_s22, %s277_s23  }
   0x9   :  { %268 = dma.done.wait [#allocation4], 128  }
   0xa   :  { %269 = vsyncadd [#allocation4], 4294967168 }
   0xb   :  { %270 = dma.done.wait [#allocation7], 2048  }
   0xc   :  { %271 = vsyncadd [#allocation7], 4294965248  ;;  %v72_v0 = vlaneseq  ;;  %v58_v1 = vld [vmem:[#allocation6 + $0x18] sm:$0xff]  ;;  %v57_v2 = vld [vmem:[#allocation6 + $0x10] sm:$0xff]  ;;  %s278_s24 = smov [#allocation8]   ;;  %s178_s28 = sshll.u32 %s314_s3, 4  ;;  %s179_s28 = int_to_ptr.hbm [resolvable:$true] %s178_s28 }
   0xd   :  { %156 = vmatpush.msra.mxu0 %v58_v1  ;;  %v56_v4 = vld [vmem:[#allocation6 + $0x8] sm:$0xff]  ;;  %v55_v5 = vld [vmem:[#allocation6] sm:$0xff]  ;;  %v54_v6 = vld [vmem:[#allocation3] sm:$0xff]  ;;  %s176_s25 = sshll.u32 %s278_s24, 4  ;;  %s177_s25 = int_to_ptr.vmem [resolvable:$true] %s176_s25 }
   0xe   :  { %v73_v3 = vand.u32 127, %v72_v0  ;;  %v195_v7 = vld [vmem:[%s313_s2] ss:$0 sm:$0xff] }
   0xf   :  { %157 = vmatpush.msra.mxu0 %v57_v2 }
  0x10   :  { %vm76_vm0 = vcmp.lt.s32.totalorder %v73_v3, 32 }
  0x11   :  { %158 = vmatpush.msra.mxu0 %v56_v4 }
  0x13   :  { %159 = vmatpush.msra.mxu0 %v55_v5 }
  0x14   :  { %189 = vmatmul.msk.f32.vlgmr.msra.gmra.mxu0 %vm76_vm0, %v54_v6 }
  0x91   :  { %v161_v8 = vpop.f32.mrf.mxu0 }
  0x92   :  { %v164_v9 = vadd.f32 %v195_v7, %v161_v8 }
  0x94   :  { %170 = vst [vmem:[#allocation8] sm:$0xff] %v164_v9 }
  0x95   :  { %181 = dma.vmem_to_hbm [thread:$0]  %s177_s25, 128, %s179_s28, [#allocation5]  }
  0x96   :  { %272 = dma.done.wait [#allocation5], 128  }
  0x97   :  { %273 = vsyncadd [#allocation5], 4294967168 }
  0x98   :  { %186 = vsyncpa [#allocation4], 1 }
  0x99   :  { %187 = vsyncpa [#allocation7], 1 }
  0x9a   :  { %188 = vsyncpa [#allocation5], 1 }

</bundles_post_ra>
